<compile_context>
chip_gen: v7x
topology: tpu7x:2x2x1
jax: 0.10.0
libtpu: 0.0.40
codegen_flags: <defaults>
</compile_context>

<pallas_src>
import jax
import jax.numpy as jnp
from jax.experimental import pallas as pl
from jax.experimental.pallas import tpu as pltpu

IN_FEATURES = 256
OUT_FEATURES = 256
SUBLANE = 8        # f32 sublane count: row-tile granularity for full tiles
TB_MAX = 1024      # batch-tile cap: f32 x tile (1 MiB) + f32 out tile (1 MiB),
                   # double-buffered, + bf16 weight ~ 4.3 MiB << 16 MiB (v5e)


def linear_add_relu_kernel(x_ref, wt_ref, c_ref, out_ref):
    # x: (tb, 256) f32; wt: (256, 256) bf16; c: (1, 256) f32 (= bias + other)
    x_bf16 = x_ref[...].astype(jnp.bfloat16)          # cast on VPU, in-kernel
    y = jnp.dot(x_bf16, wt_ref[...], preferred_element_type=jnp.float32)
    out_ref[...] = jnp.maximum(y + c_ref[...], 0.0).astype(out_ref.dtype)


def _choose_tile(batch):
    if batch <= SUBLANE:
        # Block equals the full array rows (legal even if < 8); grid=(1,).
        return batch
    # Aim for >=2 grid steps so "parallel" can shard across v7x's two TCs,
    # round rows/tile up to a sublane multiple, cap for VMEM headroom.
    half = pl.cdiv(pl.cdiv(batch, 2), SUBLANE) * SUBLANE
    return min(TB_MAX, half)


def _forward_impl(x, wt_bf16, c):
    B = x.shape[0]
    tb = _choose_tile(B)
    grid = pl.cdiv(B, tb)
    flops = 2 * B * IN_FEATURES * OUT_FEATURES
    bytes_accessed = (B * IN_FEATURES * 4              # x (f32)
                      + IN_FEATURES * OUT_FEATURES * 2   # weight (bf16)
                      + OUT_FEATURES * 4                 # bias + other
                      + B * OUT_FEATURES * 4)            # out (f32)

    return pl.pallas_call(
        linear_add_relu_kernel,
        out_shape=jax.ShapeDtypeStruct((B, OUT_FEATURES), jnp.float32),
        grid=(grid,),
        in_specs=[
            pl.BlockSpec((tb, IN_FEATURES), lambda i: (i, 0)),            # x tile
            pl.BlockSpec((IN_FEATURES, OUT_FEATURES), lambda i: (0, 0)),  # W resident
            pl.BlockSpec((1, OUT_FEATURES), lambda i: (0, 0)),            # bias+other
        ],
        out_specs=pl.BlockSpec((tb, OUT_FEATURES), lambda i: (i, 0)),
        compiler_params=pltpu.CompilerParams(
            dimension_semantics=("parallel",)),
        cost_estimate=pl.CostEstimate(
            flops=flops, transcendentals=0, bytes_accessed=bytes_accessed),
    )(x, wt_bf16, c)


def make_model(weight, bias, other):
    """One-time init: pre-transpose the weight to (in, out), cast it to bf16
    for the MXU, and fold bias + other (bound at construction, as in the
    PyTorch module) into a single f32 row constant."""
    wt_bf16 = jnp.asarray(weight).T.astype(jnp.bfloat16)          # (256, 256)
    c = (jnp.asarray(bias).reshape(1, OUT_FEATURES)
         + jnp.asarray(other).reshape(1, OUT_FEATURES)).astype(jnp.float32)

    @jax.jit
    def forward(x):
        return _forward_impl(x, wt_bf16, c)

    return forward


if __name__ == "__main__":
    key = jax.random.PRNGKey(0)
    kx, kw, kb, ko = jax.random.split(key, 4)

    # Deterministic parameter init (PyTorch Linear(256, 256) shapes).
    bound = 1.0 / (IN_FEATURES ** 0.5)
    weight = jax.random.uniform(
        kw, (OUT_FEATURES, IN_FEATURES), jnp.float32, -bound, bound)
    bias = jax.random.uniform(kb, (OUT_FEATURES,), jnp.float32, -bound, bound)
    # `other` is the extra tensor added after the linear layer (bound at init).
    other = jax.random.normal(ko, (1, OUT_FEATURES), jnp.float32)

    # Module input: x1 = torch.randn(1, 256)
    x1 = jax.random.normal(kx, (1, IN_FEATURES), jnp.float32)

    forward = make_model(weight, bias, other)
    out = forward(x1)
    jax.block_until_ready(out)

    # Reference with the same bf16 MXU operands / f32 accumulation (tight).
    ref_bf16 = jnp.maximum(
        jnp.dot(x1.astype(jnp.bfloat16), weight.T.astype(jnp.bfloat16),
                preferred_element_type=jnp.float32) + bias + other, 0.0)
    # Full-f32 module semantics (loose tolerance for the bf16 matmul).
    ref_f32 = jnp.maximum(x1 @ weight.T + bias + other, 0.0)

    assert out.shape == (1, OUT_FEATURES)
    assert jnp.allclose(out, ref_bf16, atol=1e-4, rtol=1e-4)
    assert jnp.allclose(out, ref_f32, atol=5e-2, rtol=5e-2)

    # Sanity-check a multi-tile batch path (ragged last tile, grid >= 2).
    xb = jax.random.normal(jax.random.PRNGKey(1), (37, IN_FEATURES), jnp.float32)
    outb = jax.block_until_ready(forward(xb))
    refb = jnp.maximum(xb @ weight.T + bias + other, 0.0)
    assert outb.shape == (37, OUT_FEATURES)
    assert jnp.allclose(outb, refb, atol=5e-2, rtol=5e-2)

    print("KERNEL_OK")
</pallas_src>

<mosaic_0001>
module attributes {stable_mosaic.version = 11 : i64} {
  func.func @linear_add_relu_kernel(%arg0: i32, %arg1: memref<1x256xf32, #tpu.memory_space<vmem>>, %arg2: memref<256x256xbf16, #tpu.memory_space<vmem>>, %arg3: memref<1x256xf32, #tpu.memory_space<vmem>>, %arg4: memref<1x256xf32, #tpu.memory_space<vmem>>) attributes {dimension_semantics = [#tpu.dimension_semantics<parallel>], iteration_bounds = array<i64: 1>, scalar_prefetch = 0 : i64, scratch_operands = 0 : i64, tpu.core_type = #tpu.core_type<tc>, window_params = [{transform_indices = @transform_0, window_bounds = array<i64: 1, 256>}, {pipeline_mode = #tpu.pipeline_mode<synchronous>, transform_indices = @transform_1, window_bounds = array<i64: 256, 256>}, {pipeline_mode = #tpu.pipeline_mode<synchronous>, transform_indices = @transform_2, window_bounds = array<i64: 1, 256>}, {transform_indices = @transform_3, window_bounds = array<i64: 1, 256>}]} {
    %c0 = arith.constant 0 : index
    %c0_0 = arith.constant 0 : index
    %0 = vector.load %arg1[%c0, %c0_0] : memref<1x256xf32, #tpu.memory_space<vmem>>, vector<1x256xf32>
    %1 = arith.truncf %0 : vector<1x256xf32> to vector<1x256xbf16>
    %c0_1 = arith.constant 0 : index
    %c0_2 = arith.constant 0 : index
    %2 = vector.load %arg2[%c0_1, %c0_2] : memref<256x256xbf16, #tpu.memory_space<vmem>>, vector<256x256xbf16>
    %cst = arith.constant dense<0.000000e+00> : vector<1x256xf32>
    %3 = tpu.matmul %1, %2, %cst {dimension_numbers = #tpu.dot_dimension_numbers<[1], [0], [0], [1], [0, 0, 1, 1], [], []>} : vector<1x256xbf16>, vector<256x256xbf16>, vector<1x256xf32> -> vector<1x256xf32>
    %c0_3 = arith.constant 0 : index
    %c0_4 = arith.constant 0 : index
    %4 = vector.load %arg3[%c0_3, %c0_4] : memref<1x256xf32, #tpu.memory_space<vmem>>, vector<1x256xf32>
    %5 = arith.addf %3, %4 : vector<1x256xf32>
    %cst_5 = arith.constant 0.000000e+00 : f32
    %6 = vector.broadcast %cst_5 : f32 to vector<1x256xf32>
    %7 = arith.maximumf %5, %6 : vector<1x256xf32>
    %c0_6 = arith.constant 0 : index
    %c0_7 = arith.constant 0 : index
    %8 = vector.load %arg4[%c0_6, %c0_7] : memref<1x256xf32, #tpu.memory_space<vmem>>, vector<1x256xf32>
    tpu.vector_store %arg4[%c0_6, %c0_7], %7 {strides = array<i32>} : memref<1x256xf32, #tpu.memory_space<vmem>>, vector<1x256xf32>,
    return
  }
  func.func @transform_0(%arg0: i32) -> (i32, i32) {
    %c0_i32 = arith.constant 0 : i32
    %c0_i32_0 = arith.constant 0 : i32
    return %arg0, %c0_i32 : i32, i32
  }
  func.func @transform_1(%arg0: i32) -> (i32, i32) {
    %c0_i32 = arith.constant 0 : i32
    %c0_i32_0 = arith.constant 0 : i32
    %c0_i32_1 = arith.constant 0 : i32
    return %c0_i32, %c0_i32_0 : i32, i32
  }
  func.func @transform_2(%arg0: i32) -> (i32, i32) {
    %c0_i32 = arith.constant 0 : i32
    %c0_i32_0 = arith.constant 0 : i32
    %c0_i32_1 = arith.constant 0 : i32
    return %c0_i32, %c0_i32_0 : i32, i32
  }
  func.func @transform_3(%arg0: i32) -> (i32, i32) {
    %c0_i32 = arith.constant 0 : i32
    %c0_i32_0 = arith.constant 0 : i32
    return %arg0, %c0_i32 : i32, i32
  }
}

</mosaic_0001>

<bundles_post_ra>
// kernel: forward.1
= control target key start
LH: loop header
LB: loop body
LE: loop exit
PB: predicated region body
PF: predicated region fallthrough
CT: control target
= control target key end

     0   :  { %v17_v7 = vlaneseq  ;;  %s562_s0 = inlined_call_operand.vmem [shape: f32[1,256], index: 0, kind: input, shape index: {}]   ;;  %s563_s1 = inlined_call_operand.vmem [shape: bf16[256,256], index: 1, kind: input, shape index: {}]   ;;  %s564_s2 = inlined_call_operand.vmem [shape: f32[1,256], index: 2, kind: input, shape index: {}]   ;;  %s565_s3 = inlined_call_operand.hbm [shape: f32[1,256], index: 3, kind: output, shape index: {}]  }
   0x1   :  { %v347_v0 = vld [vmem:[%s563_s1 + $0x4] ss:$8 sps:$4 sm:$0xff]   ;;  %v349_v1 = vld [vmem:[%s563_s1] ss:$8 sps:$4 sm:$0xff]   ;;  %v350_v2 = vld [vmem:[%s563_s1 + $0x14] ss:$8 sps:$4 sm:$0xff]  }
   0x2   :  { %233 = vmatprep.subr.bf16.mxu0 %v347_v0  ;;  %v352_v3 = vld [vmem:[%s563_s1 + $0x10] ss:$8 sps:$4 sm:$0xff]   ;;  %v353_v4 = vld [vmem:[%s563_s1 + $0x24] ss:$8 sps:$4 sm:$0xff]   ;;  %v355_v5 = vld [vmem:[%s563_s1 + $0x20] ss:$8 sps:$4 sm:$0xff]  }
   0x3   :  { %234 = vmatpush1.bf16.msra.mxu0 %v349_v1  ;;  %v356_v6 = vld [vmem:[%s563_s1 + $0x34] ss:$8 sps:$4 sm:$0xff]   ;;  %v358_v8 = vld [vmem:[%s563_s1 + $0x30] ss:$8 sps:$4 sm:$0xff]   ;;  %v359_v9 = vld [vmem:[%s563_s1 + $0x44] ss:$8 sps:$4 sm:$0xff]  }
   0x4   :  { %235 = vmatprep.subr.bf16.mxu0 %v350_v2  ;;  %v469_v10 = vshrl.u32 %v17_v7, 7  ;;  %v361_v11 = vld [vmem:[%s563_s1 + $0x40] ss:$8 sps:$4 sm:$0xff]   ;;  %v362_v12 = vld [vmem:[%s563_s1 + $0x54] ss:$8 sps:$4 sm:$0xff]  }
   0x5   :  { %v364_v14 = vld [vmem:[%s563_s1 + $0x50] ss:$8 sps:$4 sm:$0xff]   ;;  %v365_v15 = vld [vmem:[%s563_s1 + $0x64] ss:$8 sps:$4 sm:$0xff]   ;;  %v15_v16 = vld [vmem:[%s562_s0] sm:$0x3] }
   0x6   :  { %v23_v13 = vsub.s32 1, %v469_v10 }
   0x7   :  { %236 = vmatpush1.bf16.msra.mxu0 %v352_v3 }
   0x8   :  { %237 = vmatprep.subr.bf16.mxu0 %v353_v4  ;;  %v24_v17 = vrot.slane %v15_v16, %v23_v13 }
   0xb   :  { %238 = vmatpush1.bf16.msra.mxu0 %v355_v5 }
   0xc   :  { %239 = vmatprep.subr.bf16.mxu0 %v356_v6 }
   0xf   :  { %240 = vmatpush1.bf16.msra.mxu0 %v358_v8 }
  0x10   :  { %241 = vmatprep.subr.bf16.mxu0 %v359_v9 }
  0x13   :  { %242 = vmatpush1.bf16.msra.mxu0 %v361_v11 }
  0x14   :  { %243 = vmatprep.subr.bf16.mxu0 %v362_v12 }
  0x15   :  { %8 = vsyncpa [#allocation3], 0  ;;  %v367_v18 = vld [vmem:[%s563_s1 + $0x60] ss:$8 sps:$4 sm:$0xff]   ;;  %v368_v19 = vld [vmem:[%s563_s1 + $0x74] ss:$8 sps:$4 sm:$0xff]   ;;  %v28_v20 = vpack.c.bf16 %v24_v17, %v24_v17 }
  0x16   :  { %v370_v21 = vld [vmem:[%s563_s1 + $0x70] ss:$8 sps:$4 sm:$0xff]   ;;  %v371_v22 = vld [vmem:[%s563_s1 + $0x84] ss:$8 sps:$4 sm:$0xff]   ;;  %v373_v23 = vld [vmem:[%s563_s1 + $0x80] ss:$8 sps:$4 sm:$0xff]  }
  0x17   :  { %244 = vmatpush1.bf16.msra.mxu0 %v364_v14  ;;  %265 = vmatprep.mubr.bf16.mxu0 %v28_v20  ;;  %v374_v24 = vld [vmem:[%s563_s1 + $0x94] ss:$8 sps:$4 sm:$0xff]   ;;  %v376_v25 = vld [vmem:[%s563_s1 + $0x90] ss:$8 sps:$4 sm:$0xff]   ;;  %v377_v26 = vld [vmem:[%s563_s1 + $0xa4] ss:$8 sps:$4 sm:$0xff]  }
  0x18   :  { %245 = vmatprep.subr.bf16.mxu0 %v365_v15  ;;  %v379_v27 = vld [vmem:[%s563_s1 + $0xa0] ss:$8 sps:$4 sm:$0xff]   ;;  %v380_v28 = vld [vmem:[%s563_s1 + $0xb4] ss:$8 sps:$4 sm:$0xff]   ;;  %v382_v29 = vld [vmem:[%s563_s1 + $0xb0] ss:$8 sps:$4 sm:$0xff]  }
  0x19   :  { %v383_v30 = vld [vmem:[%s563_s1 + $0xc4] ss:$8 sps:$4 sm:$0xff]   ;;  %v385_v31 = vld [vmem:[%s563_s1 + $0xc0] ss:$8 sps:$4 sm:$0xff]   ;;  %v386_v32 = vld [vmem:[%s563_s1 + $0xd4] ss:$8 sps:$4 sm:$0xff]  }
  0x1a   :  { %v388_v33 = vld [vmem:[%s563_s1 + $0xd0] ss:$8 sps:$4 sm:$0xff]   ;;  %v389_v34 = vld [vmem:[%s563_s1 + $0xe4] ss:$8 sps:$4 sm:$0xff]   ;;  %v19_v35 = vsub.s32 0, %v469_v10  ;;  %vm296_vm0 = vcmp.lt.s32.totalorder %v17_v7, 256 }
  0x1b   :  { %246 = vmatpush1.bf16.msra.mxu0 %v367_v18  ;;  %v391_v36 = vld [vmem:[%s563_s1 + $0xe0] ss:$8 sps:$4 sm:$0xff]   ;;  %v392_v37 = vld [vmem:[%s563_s1 + $0xf4] ss:$8 sps:$4 sm:$0xff]   ;;  %v394_v39 = vld [vmem:[%s563_s1 + $0xf0] ss:$8 sps:$4 sm:$0xff]  }
  0x1c   :  { %247 = vmatprep.subr.bf16.mxu0 %v368_v19  ;;  %v20_v38 = vrot.slane %v15_v16, %v19_v35  ;;  %v61_v41 = vld [vmem:[%s564_s2] sm:$0x3]  ;;  %v419_v42 = vmov 1966171168   ;;  %s420_s1 = smov [#allocation2]  }
  0x1d   :  { %v280_v43 = vunpack.c.l.s4 %v419_v42  ;;  %v226_v44 = vrot.slane %v61_v41, %v19_v35  ;;  %v230_v45 = vrot.slane %v61_v41, %v23_v13  ;;  %s305_s24 = sshll.u32 %s420_s1, 4  ;;  %s306_s24 = int_to_ptr.vmem [resolvable:$true] %s305_s24 }
  0x1e   :  { %v27_v40 = vpack.c.bf16 %v20_v38, %v20_v38  ;;  %s395_s2 = scalar_lea.vmem %s306_s24, 32  ;;  %p400_p1 = scmp.lt.s32.totalorder %s306_s24, %s306_s24 }
  0x1f   :  { %248 = vmatpush1.bf16.msra.mxu0 %v370_v21  ;;  %v281_v47 = vunpack.c.0.s8 %v280_v43  ;;  %p396_p0 = scmp.ne.s32.totalorder %s306_s24, %s395_s2  ;;  %p401_p2 = scmp.lt.s32.totalorder %s395_s2, %s395_s2 }
  0x20   :  { %249 = vmatprep.subr.bf16.mxu0 %v371_v22 }
  0x21   :  { %v284_v55 = vsub.s32 %v281_v47, %v469_v10  ;;  %p402_p3 = por %p401_p2, %p400_p1 }
  0x23   :  { %250 = vmatpush1.bf16.msra.mxu0 %v373_v23  ;;  %p403_p4 = pnand %p402_p3, %p396_p0 }
  0x24   :  { %251 = vmatprep.subr.bf16.mxu0 %v374_v24 }
  0x27   :  { %252 = vmatpush1.bf16.msra.mxu0 %v376_v25 }
  0x28   :  { %253 = vmatprep.subr.bf16.mxu0 %v377_v26 }
  0x2b   :  { %254 = vmatpush1.bf16.msra.mxu0 %v379_v27 }
  0x2c   :  { %255 = vmatprep.subr.bf16.mxu0 %v380_v28 }
  0x2f   :  { %256 = vmatpush1.bf16.msra.mxu0 %v382_v29 }
  0x30   :  { %257 = vmatprep.subr.bf16.mxu0 %v383_v30 }
  0x33   :  { %258 = vmatpush1.bf16.msra.mxu0 %v385_v31 }
  0x34   :  { %259 = vmatprep.subr.bf16.mxu0 %v386_v32 }
  0x37   :  { %260 = vmatpush1.bf16.msra.mxu0 %v388_v33 }
  0x38   :  { %261 = vmatprep.subr.bf16.mxu0 %v389_v34 }
  0x3b   :  { %262 = vmatpush1.bf16.msra.mxu0 %v391_v36 }
  0x3c   :  { %263 = vmatprep.subr.bf16.mxu0 %v392_v37 }
  0x3f   :  { %264 = vmatpush1.bf16.msra.mxu0 %v394_v39 }
  0x42   :  { %266 = vmatmul.mubr.bf16.vlgmr.msra.gmra.mrb[0].mxu0 %v27_v40 }
 0x115   :  { %v267_v46 = vpop.f32.mrb[0].mxu0 }
 0x116   :  { %v268_v48 = vadd.f32 %v267_v46, %v226_v44  ;;  %v269_v49 = vpop.f32.mrb[1].mxu0 }
 0x117   :  { %v270_v50 = vadd.f32 %v269_v49, %v230_v45  ;;  %v271_v51 = vpop.f32.mrb[2].mxu0 }
 0x118   :  { %v274_v52 = vmax.f32 %v268_v48, 0.0  ;;  %v272_v53 = vpop.f32.mrb[3].mxu0 }
 0x119   :  { %v275_v54 = vmax.f32 %v270_v50, 0.0 }
 0x11b   :  { %v278_v56 = vcombine.low %v274_v52, %v275_v54 }
 0x11d   :  { %v285_v57 = vrot.slane %v278_v56, %v284_v55 }
 0x11f   :  { %v292_v58 = vrot.slane %v285_v57, %v284_v55 }
 0x121   :  { %298 = vst.msk [vmem:[#allocation2] sm:$0x3] %vm296_vm0, %v292_v58 }
 0x122   :  { %406 = shalt.err (!%p403_p4)
}
 0x123   :  { %s407_s27 = scalar_lea.hbm %s565_s3, 32 }
 0x124   :  { %p408_p5 = scmp.ne.s32.totalorder %s565_s3, %s407_s27  ;;  %p411_p6 = scmp.lt.u32.totalorder %s407_s27, %s565_s3 }
 0x126   :  { %p413_p7 = pnand %p411_p6, %p408_p5 }
 0x128   :  { %416 = shalt.err (!%p413_p7)
}
 0x129   :  { %308 = dma.vmem_to_hbm [thread:$0]  %s306_s24, 32, %s565_s3, [#allocation3]  }
 0x12a   :  { %417 = dma.done.wait [#allocation3], 32  }
 0x12b   :  { %418 = vsyncadd [#allocation3], 4294967264 }
 0x12c   :  { %312 = vsyncpa [#allocation3], 1 }

</bundles_post_ra>
